<compile_context>
chip_gen: v6e
topology: v6e:2x2x1
jax: 0.10.0
libtpu: 0.0.40
codegen_flags: <defaults>
</compile_context>

<pallas_src>
import functools

import jax
import jax.numpy as jnp
from jax.experimental import pallas as pl
from jax.experimental.pallas import tpu as pltpu


# Upper bound on the L-tile size; tables are padded by this many rows so the
# ragged last tile's table DMA stays in bounds.
_MAX_TILE_ROWS = 1024


# ----------------------------------------------------------------------------
# Parameter / buffer setup (equivalent of RoPE.__init__ / _precompute_inv_freq)
# ----------------------------------------------------------------------------
def precompute_rope_tables(max_seq_len, head_dim, rope_hidden_size, rope_theta):
    """Returns ((cos, sin) compact [T, half] tables for the reference,
    (cos_head, sneg_head) compact per-head [T + pad, D] lane patterns)."""
    half = rope_hidden_size // 2
    i = jnp.arange(0, rope_hidden_size, 2, dtype=jnp.float32)
    inv_freq = (1.0 / rope_theta) ** (i / rope_hidden_size)              # [half]
    t = jnp.arange(0, max_seq_len, dtype=jnp.float32)                    # [T]
    freqs = jnp.einsum("i,j->ij", t, inv_freq)                           # [T, half]
    cos, sin = jnp.cos(freqs), jnp.sin(freqs)                            # [T, half]

    n_pass = head_dim - rope_hidden_size
    ones_pass = jnp.ones((max_seq_len, n_pass), jnp.float32)
    zeros_pass = jnp.zeros((max_seq_len, n_pass), jnp.float32)
    # per-head lane pattern across the D channels of one head
    cos_head = jnp.concatenate([cos, cos, ones_pass], axis=-1)           # [T, D]
    sneg_head = jnp.concatenate([-sin, jnp.zeros_like(sin), zeros_pass],
                                axis=-1)                                 # [T, D]

    # Row padding: the ragged last L-tile may DMA up to _MAX_TILE_ROWS - 1 rows
    # past max_seq_len; pad with benign values (cos=1, sin=0).  Those rows only
    # feed output rows that Pallas masks out on writeback.
    pad_c = jnp.ones((_MAX_TILE_ROWS, head_dim), jnp.float32)
    pad_s = jnp.zeros((_MAX_TILE_ROWS, head_dim), jnp.float32)
    cos_head = jnp.concatenate([cos_head, pad_c], axis=0)
    sneg_head = jnp.concatenate([sneg_head, pad_s], axis=0)
    return (cos, sin), (cos_head, sneg_head)


# ----------------------------------------------------------------------------
# Chip-aware VMEM sizing
# ----------------------------------------------------------------------------
def _vmem_caps():
    phys = 64 * 1024 * 1024                       # conservative (v7x) fallback
    try:
        info = pltpu.get_tpu_info()
        phys = int(getattr(info, "vmem_capacity_bytes", phys))
    except Exception:
        pass
    limit = min(phys * 3 // 4, 96 * 1024 * 1024)  # scoped-VMEM limit request
    budget = min(phys * 3 // 10, 48 * 1024 * 1024)  # pipeline+scratch budget
    return budget, limit


def _pick_tile(L, HD, D, x_itemsize, block_l, vmem_budget):
    """Largest L-tile (multiple of 8) within the VMEM budget.  Always produces
    >= 2 grid blocks when L > 8 (megacore on v7x); last block may be ragged."""
    if L <= 8:
        return L                                  # single block == full dim (legal)
    # per-row VMEM: double-buffered x in + out, f32 working set, table buffers
    per_row = 4 * HD * x_itemsize + 6 * HD * 4 + 8 * D
    cap = max(8, (vmem_budget // per_row) // 8 * 8)
    two_blocks = ((L + 1) // 2 + 7) // 8 * 8      # forces at least 2 grid blocks
    tl = min(block_l, _MAX_TILE_ROWS, cap, two_blocks)
    return max(8, tl // 8 * 8)


# ----------------------------------------------------------------------------
# Pallas kernel: lane-dense rotation on the folded [L, H*D] layout
# ----------------------------------------------------------------------------
def _rope_kernel(start_ref, x_ref, cos_hbm, sneg_hbm, o_ref,
                 cos_buf, sneg_buf, sem, *, half, hd, num_heads, tl):
    # start_ref : (1,) int32 SMEM (scalar-prefetched start_index)
    # x_ref     : (tl, HD) input dtype, auto-pipelined VMEM block
    # cos_hbm   : (T+pad, D) f32 in HBM  (1.0 on pass-through lanes)
    # sneg_hbm  : (T+pad, D) f32 in HBM  (-sin on first rope half, else 0)
    # cos_buf/sneg_buf : (tl, D) f32 VMEM scratch ; sem : DMA semaphores (2,)
    row0 = start_ref[0] + pl.program_id(0) * tl
    cos_cp = pltpu.make_async_copy(cos_hbm.at[pl.ds(row0, tl)], cos_buf, sem.at[0])
    sin_cp = pltpu.make_async_copy(sneg_hbm.at[pl.ds(row0, tl)], sneg_buf, sem.at[1])
    cos_cp.start()
    sin_cp.start()

    xf = x_ref[...].astype(jnp.float32)
    # roll left by `half`:  x_left[c] = x[(c + half) % HD]  -> x2 under x1 lanes
    x_left = pltpu.roll(xf, hd - half, 1)

    cos_cp.wait()
    sin_cp.wait()
    cos = jnp.tile(cos_buf[...], (1, num_heads))      # (tl, HD)
    s = jnp.tile(sneg_buf[...], (1, num_heads))       # (tl, HD)
    # roll right by `half`: brings (-sin*x1) under the x2 lanes
    sx_right = pltpu.roll(s * xf, half, 1)

    o_ref[...] = (cos * xf + s * x_left - sx_right).astype(o_ref.dtype)


# ----------------------------------------------------------------------------
# Wrapper (the "forward" of the module)
# ----------------------------------------------------------------------------
@functools.partial(jax.jit, static_argnames=("rope_half", "block_l"))
def rope_forward(x, cos_head, sneg_head, start_index, *, rope_half: int,
                 block_l: int = _MAX_TILE_ROWS):
    """
    x:           [L, H, D]
    cos_head:    [max_seq_len + _MAX_TILE_ROWS, D]  per-head cos pattern (f32)
    sneg_head:   [max_seq_len + _MAX_TILE_ROWS, D]  per-head -sin pattern (f32)
    start_index: int / int32 scalar (dynamic - no recompilation per step)
    returns      [L, H, D], dtype == x.dtype
    """
    L, H, D = x.shape
    HD = H * D
    assert cos_head.shape[-1] == D and sneg_head.shape[-1] == D
    # TODO(synk): the PyTorch module asserts start_index + L <= max_seq_len;
    # start_index is traced here, so that range check is left to the caller.

    x2d = x.reshape(L, HD)                            # contiguous -> free
    start = jnp.asarray(start_index, jnp.int32).reshape((1,))

    vmem_budget, vmem_limit = _vmem_caps()
    tl = _pick_tile(L, HD, D, x.dtype.itemsize, block_l, vmem_budget)
    grid = (pl.cdiv(L, tl),)

    out2d = pl.pallas_call(
        functools.partial(_rope_kernel, half=rope_half, hd=HD, num_heads=H, tl=tl),
        out_shape=jax.ShapeDtypeStruct((L, HD), x.dtype),
        grid_spec=pltpu.PrefetchScalarGridSpec(
            num_scalar_prefetch=1,
            grid=grid,
            in_specs=[
                pl.BlockSpec((tl, HD), lambda i, s: (i, 0)),   # x tile
                pl.BlockSpec(memory_space=pl.ANY),             # cos table (HBM)
                pl.BlockSpec(memory_space=pl.ANY),             # -sin table (HBM)
            ],
            out_specs=pl.BlockSpec((tl, HD), lambda i, s: (i, 0)),
            scratch_shapes=[
                pltpu.VMEM((tl, D), jnp.float32),
                pltpu.VMEM((tl, D), jnp.float32),
                pltpu.SemaphoreType.DMA((2,)),
            ],
        ),
        compiler_params=pltpu.CompilerParams(
            dimension_semantics=("parallel",),
            vmem_limit_bytes=vmem_limit,
        ),
    )(start, x2d, cos_head, sneg_head)
    return out2d.reshape(L, H, D)


# ----------------------------------------------------------------------------
# Pure-JAX reference (mirrors the PyTorch code path) for a sanity check
# ----------------------------------------------------------------------------
def rope_reference(x, cos_table, sin_table, start_index):
    L, H, D = x.shape
    half = cos_table.shape[-1]
    Dr = 2 * half
    x_rope, x_pass = x[..., :Dr], x[..., Dr:]
    cos = cos_table[start_index:start_index + L][:, None, :]
    sin = sin_table[start_index:start_index + L][:, None, :]
    x1 = x_rope[..., :half].astype(jnp.float32)
    x2 = x_rope[..., half:].astype(jnp.float32)
    o1 = cos * x1 - sin * x2
    o2 = sin * x1 + cos * x2
    out = jnp.concatenate([o1, o2, x_pass.astype(jnp.float32)], axis=-1)
    return out.astype(x.dtype)   # note: kernel keeps input dtype (module intent)


if __name__ == "__main__":
    # TransformerArgs-equivalent configuration (deterministic, in-script)
    max_seq_len = 64
    rope_theta = 10000.0
    hidden_size = 128
    num_attention_heads = 4
    rope_partial_factor = 0.5

    head_dim = hidden_size // num_attention_heads            # D = 32
    rope_hidden_size = int(rope_partial_factor * head_dim)   # Dr = 16
    assert rope_hidden_size % 2 == 0
    half = rope_hidden_size // 2

    (cos_t, sin_t), (cos_head, sneg_head) = precompute_rope_tables(
        max_seq_len, head_dim, rope_hidden_size, rope_theta)

    H, D = num_attention_heads, head_dim
    key = jax.random.PRNGKey(0)
    k1, k2 = jax.random.split(key)

    # Case 1: aligned L, nonzero start_index.
    L1, s1 = 16, 3
    x1 = jax.random.normal(k1, (L1, H, D), dtype=jnp.float32)
    out1 = jax.block_until_ready(
        rope_forward(x1, cos_head, sneg_head, s1, rope_half=half))
    ref1 = rope_reference(x1, cos_t, sin_t, s1)
    assert out1.shape == (L1, H, D) and out1.dtype == x1.dtype
    assert jnp.allclose(out1, ref1, atol=1e-5, rtol=1e-5), "mismatch (aligned L)"

    # Case 2: ragged L (last grid block partially valid), different start.
    L2, s2 = 13, 5
    x2 = jax.random.normal(k2, (L2, H, D), dtype=jnp.float32)
    out2 = jax.block_until_ready(
        rope_forward(x2, cos_head, sneg_head, s2, rope_half=half))
    ref2 = rope_reference(x2, cos_t, sin_t, s2)
    assert out2.shape == (L2, H, D) and out2.dtype == x2.dtype
    assert jnp.allclose(out2, ref2, atol=1e-5, rtol=1e-5), "mismatch (ragged L)"

    print("KERNEL_OK")
</pallas_src>

<mosaic_0001>
module attributes {stable_mosaic.version = 11 : i64} {
  func.func @_rope_kernel(%arg0: i32, %arg1: memref<1xi32, #tpu.memory_space<smem>>, %arg2: memref<8x128xf32, #tpu.memory_space<vmem>>, %arg3: memref<1088x32xf32, #tpu.memory_space<any>>, %arg4: memref<1088x32xf32, #tpu.memory_space<any>>, %arg5: memref<8x128xf32, #tpu.memory_space<vmem>>, %arg6: memref<8x32xf32, #tpu.memory_space<vmem>>, %arg7: memref<8x32xf32, #tpu.memory_space<vmem>>, %arg8: memref<2x!tpu.dma_semaphore, #tpu.memory_space<semaphore_mem>>) attributes {dimension_semantics = [#tpu.dimension_semantics<parallel>], iteration_bounds = array<i64: 2>, scalar_prefetch = 1 : i64, scratch_operands = 3 : i64, tpu.core_type = #tpu.core_type<tc>, window_params = [{transform_indices = @transform_0, window_bounds = array<i64: 8, 128>}, {}, {}, {transform_indices = @transform_3, window_bounds = array<i64: 8, 128>}]} {
    %c0 = arith.constant 0 : index
    %0 = memref.load %arg1[%c0] : memref<1xi32, #tpu.memory_space<smem>>
    %c8_i32 = arith.constant 8 : i32
    %1 = arith.muli %arg0, %c8_i32 : i32
    %2 = arith.addi %0, %1 : i32
    %c0_i32 = arith.constant 0 : i32
    %c0_i32_0 = arith.constant 0 : i32
    %3 = tpu.memref_slice %arg3[%2, %c0_i32_0] : memref<1088x32xf32, #tpu.memory_space<any>> -> memref<8x32xf32, #tpu.memory_space<any>>
    %4 = tpu.memref_slice %arg8[%c0_i32] : memref<2x!tpu.dma_semaphore, #tpu.memory_space<semaphore_mem>> -> memref<1x!tpu.dma_semaphore, #tpu.memory_space<semaphore_mem>>
    %5 = tpu.memref_squeeze %4 : memref<1x!tpu.dma_semaphore, #tpu.memory_space<semaphore_mem>> -> memref<!tpu.dma_semaphore, #tpu.memory_space<semaphore_mem>>
    tpu.enqueue_dma source(%3 : memref<8x32xf32, #tpu.memory_space<any>>) target(%arg6 : memref<8x32xf32, #tpu.memory_space<vmem>>) target_semaphore(%5 : memref<!tpu.dma_semaphore, #tpu.memory_space<semaphore_mem>>)
    %c1_i32 = arith.constant 1 : i32
    %c0_i32_1 = arith.constant 0 : i32
    %6 = tpu.memref_slice %arg4[%2, %c0_i32_1] : memref<1088x32xf32, #tpu.memory_space<any>> -> memref<8x32xf32, #tpu.memory_space<any>>
    %7 = tpu.memref_slice %arg8[%c1_i32] : memref<2x!tpu.dma_semaphore, #tpu.memory_space<semaphore_mem>> -> memref<1x!tpu.dma_semaphore, #tpu.memory_space<semaphore_mem>>
    %8 = tpu.memref_squeeze %7 : memref<1x!tpu.dma_semaphore, #tpu.memory_space<semaphore_mem>> -> memref<!tpu.dma_semaphore, #tpu.memory_space<semaphore_mem>>
    tpu.enqueue_dma source(%6 : memref<8x32xf32, #tpu.memory_space<any>>) target(%arg7 : memref<8x32xf32, #tpu.memory_space<vmem>>) target_semaphore(%8 : memref<!tpu.dma_semaphore, #tpu.memory_space<semaphore_mem>>)
    %c0_2 = arith.constant 0 : index
    %c0_3 = arith.constant 0 : index
    %9 = vector.load %arg2[%c0_2, %c0_3] : memref<8x128xf32, #tpu.memory_space<vmem>>, vector<8x128xf32>
    %c120_i32 = arith.constant 120 : i32
    %10 = tpu.dynamic_rotate %9 by %c120_i32 dim 1 : vector<8x128xf32>, i32 -> vector<8x128xf32>
    %c0_i32_4 = arith.constant 0 : i32
    %c0_i32_5 = arith.constant 0 : i32
    %11 = tpu.memref_slice %arg3[%2, %c0_i32_5] : memref<1088x32xf32, #tpu.memory_space<any>> -> memref<8x32xf32, #tpu.memory_space<any>>
    %12 = tpu.memref_slice %arg8[%c0_i32_4] : memref<2x!tpu.dma_semaphore, #tpu.memory_space<semaphore_mem>> -> memref<1x!tpu.dma_semaphore, #tpu.memory_space<semaphore_mem>>
    %13 = tpu.memref_squeeze %12 : memref<1x!tpu.dma_semaphore, #tpu.memory_space<semaphore_mem>> -> memref<!tpu.dma_semaphore, #tpu.memory_space<semaphore_mem>>
    tpu.wait_dma2 semaphore(%13 : memref<!tpu.dma_semaphore, #tpu.memory_space<semaphore_mem>>) src(%11 : memref<8x32xf32, #tpu.memory_space<any>>) dst(%arg6 : memref<8x32xf32, #tpu.memory_space<vmem>>)
    %c1_i32_6 = arith.constant 1 : i32
    %c0_i32_7 = arith.constant 0 : i32
    %14 = tpu.memref_slice %arg4[%2, %c0_i32_7] : memref<1088x32xf32, #tpu.memory_space<any>> -> memref<8x32xf32, #tpu.memory_space<any>>
    %15 = tpu.memref_slice %arg8[%c1_i32_6] : memref<2x!tpu.dma_semaphore, #tpu.memory_space<semaphore_mem>> -> memref<1x!tpu.dma_semaphore, #tpu.memory_space<semaphore_mem>>
    %16 = tpu.memref_squeeze %15 : memref<1x!tpu.dma_semaphore, #tpu.memory_space<semaphore_mem>> -> memref<!tpu.dma_semaphore, #tpu.memory_space<semaphore_mem>>
    tpu.wait_dma2 semaphore(%16 : memref<!tpu.dma_semaphore, #tpu.memory_space<semaphore_mem>>) src(%14 : memref<8x32xf32, #tpu.memory_space<any>>) dst(%arg7 : memref<8x32xf32, #tpu.memory_space<vmem>>)
    %c0_8 = arith.constant 0 : index
    %c0_9 = arith.constant 0 : index
    %17 = vector.load %arg6[%c0_8, %c0_9] : memref<8x32xf32, #tpu.memory_space<vmem>>, vector<8x32xf32>
    %18 = tpu.concatenate %17, %17, %17, %17 in 1 : vector<8x32xf32>, vector<8x32xf32>, vector<8x32xf32>, vector<8x32xf32> -> vector<8x128xf32>
    %c0_10 = arith.constant 0 : index
    %c0_11 = arith.constant 0 : index
    %19 = vector.load %arg7[%c0_10, %c0_11] : memref<8x32xf32, #tpu.memory_space<vmem>>, vector<8x32xf32>
    %20 = tpu.concatenate %19, %19, %19, %19 in 1 : vector<8x32xf32>, vector<8x32xf32>, vector<8x32xf32>, vector<8x32xf32> -> vector<8x128xf32>
    %21 = arith.mulf %20, %9 : vector<8x128xf32>
    %c8_i32_12 = arith.constant 8 : i32
    %22 = tpu.dynamic_rotate %21 by %c8_i32_12 dim 1 : vector<8x128xf32>, i32 -> vector<8x128xf32>
    %23 = arith.mulf %18, %9 : vector<8x128xf32>
    %24 = arith.mulf %20, %10 : vector<8x128xf32>
    %25 = arith.addf %23, %24 : vector<8x128xf32>
    %26 = arith.subf %25, %22 : vector<8x128xf32>
    %c0_13 = arith.constant 0 : index
    %c0_14 = arith.constant 0 : index
    %27 = vector.load %arg5[%c0_13, %c0_14] : memref<8x128xf32, #tpu.memory_space<vmem>>, vector<8x128xf32>
    tpu.vector_store %arg5[%c0_13, %c0_14], %26 {strides = array<i32>} : memref<8x128xf32, #tpu.memory_space<vmem>>, vector<8x128xf32>,
    return
  }
  func.func @transform_0(%arg0: i32, %arg1: memref<1xi32, #tpu.memory_space<smem>>) -> (i32, i32) {
    %c0_i32 = arith.constant 0 : i32
    %c0_i32_0 = arith.constant 0 : i32
    return %arg0, %c0_i32 : i32, i32
  }
  func.func @transform_3(%arg0: i32, %arg1: memref<1xi32, #tpu.memory_space<smem>>) -> (i32, i32) {
    %c0_i32 = arith.constant 0 : i32
    %c0_i32_0 = arith.constant 0 : i32
    return %arg0, %c0_i32 : i32, i32
  }
}

</mosaic_0001>

<bundles_post_ra>
// kernel: rope_forward.1
= control target key start
LH: loop header
LB: loop body
LE: loop exit
PB: predicated region body
PF: predicated region fallthrough
CT: control target
= control target key end

     0   :  { %s413_s17 = smov 0   ;;  %s439_s0 = inlined_call_operand.<no memory space> [shape: s32[1], index: 0, kind: input, shape index: {}]   ;;  %s440_s1 = inlined_call_operand.vmem [shape: f32[16,128], index: 1, kind: input, shape index: {}]   ;;  %s441_s2 = inlined_call_operand.vmem [shape: f32[1088,32], index: 2, kind: input, shape index: {}]   ;;  %s442_s3 = inlined_call_operand.vmem [shape: f32[1088,32], index: 3, kind: input, shape index: {}]   ;;  %s443_s4 = inlined_call_operand.vmem [shape: f32[16,128], index: 4, kind: output, shape index: {}]  }
   0x1   :  { %9 = sst [smem:[#allocation6]] %s439_s0 }
   0x2 LB: > { %s343_s18 = sadd.s32 4294967295, %s378_s17   ;;  %p347_p0 = scmp.ge.s32.totalorder %s378_s17, 1  ;;  %s378_s17 = sphi %s413_s17, %s15_s17  }
   0x3   : > { %p90_p1 = scmp.lt.s32.totalorder %s378_s17, 3 }
   0x5   : > { %p91_p2 = pnand %p347_p0, %p90_p1 }
   0x6   : > { %p108_p3 = scmp.lt.s32.totalorder (!%p91_p2), %s343_s18, 1  ;;  %s116_s19 = sld [smem:[#allocation6]] (!%p91_p2) }
   0x7   : > { %94 = sbr.rel (%p91_p2) target bundleno = 377 (0x179), region = 24  ;;  %s350_s21 = sshll.u32 (!%p91_p2), %s343_s18, 3 }
   0xc   : > { %s109_s20 = scalar_select %p108_p3, %s343_s18, 1 }
   0xd   : > { %s118_s28 = sadd.s32 %s350_s21, %s116_s19 }
   0xe   : > { %s348_s0 = sshll.u32 %s109_s20, 3  ;;  %s119_s5 = scalar_lea.vmem %s441_s2, %s118_s28 }
   0xf   : > { %s111_s24 = scalar_lea.vmem %s440_s1, %s348_s0  ;;  %s427_s27 = scalar_lea.vmem %s443_s4, %s348_s0  ;;  %v153_v0 = vld [vmem:[%s119_s5] sm:$0xff] }
  0x10   : > { %162 = vsyncadd [#allocation4], 128  ;;  %s163_s8 = scalar_lea.vmem %s442_s3, %s118_s28 }
  0x11   : > { %v198_v1 = vld [vmem:[%s163_s8] sm:$0xff] }
  0x12   : > { %207 = vsyncadd [#allocation4 + $0x1], 128  ;;  %v208_v2 = vld [vmem:[%s111_s24] sm:$0xff]  ;;  %s380_s9 = smov 120  }
  0x13   : > { %209 = vrot.lane.b32.xlu0 %v208_v2, %s380_s9 }
  0x85   : > { %v210_v3 = vpop.permute.xlu0 %209 }
  0x86   : > { %372 = dma.done.wait [#allocation4], 128 }
  0x87   : > { %373 = vsyncadd [#allocation4], 4294967168  ;;  %s381_s10 = smov 32   ;;  %s382_s11 = smov 96  }
  0x88   : > { %235 = vrot.lane.b32.xlu0 %v198_v1, %s381_s10  ;;  %241 = vrot.lane.b32.xlu1 %v198_v1, %s382_s11 }
  0x89   : > { %374 = dma.done.wait [#allocation4 + $0x1], 128 }
  0x8a   : > { %375 = vsyncadd [#allocation4 + $0x1], 4294967168  ;;  %s383_s12 = smov 64   ;;  %vm227_vm0 = vcmask 261120   ;;  %vm229_vm1 = vcmask 523264   ;;  %vm231_vm2 = vcmask 785408  }
  0x8b   : > { %s384_s13 = smov 8  }
  0x8c   : > { %238 = vrot.lane.b32.xlu0 %v198_v1, %s383_s12  ;;  %218 = vrot.lane.b32.xlu1 %v153_v0, %s381_s10 }
  0x90   : > { %221 = vrot.lane.b32.xlu0 %v153_v0, %s383_s12  ;;  %224 = vrot.lane.b32.xlu1 %v153_v0, %s382_s11 }
  0xfa   : > { %v236_v4 = vpop.permute.xlu0 %235  ;;  %v242_v5 = vpop.permute.xlu1 %241 }
  0xfb   : > { %v244_v6 = vsel %vm227_vm0, %v198_v1, %v236_v4 }
  0xfe   : > { %v239_v7 = vpop.permute.xlu0 %238  ;;  %v219_v8 = vpop.permute.xlu1 %218 }
  0xff   : > { %v245_v9 = vsel %vm229_vm1, %v244_v6, %v239_v7  ;;  %v228_v11 = vsel %vm227_vm0, %v153_v0, %v219_v8 }
 0x100   : > { %v246_v10 = vsel %vm231_vm2, %v245_v9, %v242_v5 }
 0x101   : > { %v247_v12 = vmul.f32 %v246_v10, %v208_v2  ;;  %v251_v18 = vmul.f32 %v246_v10, %v210_v3 }
 0x102   : > { %v222_v13 = vpop.permute.xlu0 %221  ;;  %v225_v14 = vpop.permute.xlu1 %224 }
 0x103   : > { %v230_v15 = vsel %vm229_vm1, %v228_v11, %v222_v13  ;;  %248 = vrot.lane.b32.xlu0 %v247_v12, %s384_s13 }
 0x104   : > { %v232_v16 = vsel %vm231_vm2, %v230_v15, %v225_v14 }
 0x105   : > { %v250_v17 = vmul.f32 %v232_v16, %v208_v2 }
 0x107   : > { %v252_v19 = vadd.f32 %v251_v18, %v250_v17 }
 0x175   : > { %v249_v20 = vpop.permute.xlu0 %248 }
 0x176   : > { %v253_v21 = vsub.f32 %v252_v19, %v249_v20 }
 0x178   : > { %254 = vst [vmem:[%s427_s27] sm:$0xff] %v253_v21 }
 0x179 PF: > { %s15_s17 = sadd.s32 1, %s378_s17  }
 0x17a   : > { %p12_p4 = scmp.ge.s32.totalorder %s15_s17, 4  }
 0x17c   :  { %14 = sbr.rel (!%p12_p4) target bundleno = 2 (0x2), region = 142 }
 0x181   :  { %274 = vsyncmov [#allocation4] }
 0x184   :  { %s275_s14 = vpop.sfrf %274 }
 0x185   :  { %p353_p5 = scmp.ne.s32.totalorder %s275_s14, 0 }
 0x187   :  { %279 = shalt.err (%p353_p5)  }
 0x188   :  { %281 = vsyncmov [#allocation4 + $0x1] }
 0x18b   :  { %s282_s15 = vpop.sfrf %281 }
 0x18c   :  { %p354_p6 = scmp.ne.s32.totalorder %s282_s15, 0 }
 0x18e   :  { %286 = shalt.err (%p354_p6)  }

</bundles_post_ra>
